<compile_context>
chip_gen: v7x
topology: tpu7x:2x2x1
jax: 0.10.0
libtpu: 0.0.40
codegen_flags: <defaults>
</compile_context>

<pallas_src>
import functools
import math

import jax
import jax.numpy as jnp
from jax.experimental import pallas as pl
from jax.experimental.pallas import tpu as pltpu


def _round_up(x, m):
    return ((x + m - 1) // m) * m


# --------------------------------------------------------------------------
# Path 1: VMEM-resident table, one-hot MXU gather.
# --------------------------------------------------------------------------
def _embed_onehot_kernel(ids_ref, table_ref, out_ref, *, scale, vocab, vchunk):
    """ids_ref: (T, 1) int32 VMEM; table_ref: (V, D) VMEM-resident; out_ref: (T, D)."""
    T = out_ref.shape[0]
    ids = ids_ref[...]                                   # (T, 1) int32
    acc = jnp.zeros(out_ref.shape, jnp.float32)
    n_chunks = (vocab + vchunk - 1) // vchunk

    for c in range(n_chunks):                            # static unroll over vocab chunks
        off = c * vchunk
        size = min(vchunk, vocab - off)
        iota = jax.lax.broadcasted_iota(jnp.int32, (T, size), 1) + off
        onehot = jnp.where(ids == iota, 1.0, 0.0)        # (T, size) f32, exact 0/1
        chunk = table_ref[pl.ds(off, size), :]           # static slice of resident table
        if table_ref.dtype == jnp.float32:
            # Exact bf16 hi/lo split -> selection is independent of MXU f32 mode.
            hi = chunk.astype(jnp.bfloat16)
            lo = (chunk - hi.astype(jnp.float32)).astype(jnp.bfloat16)
            oh = onehot.astype(jnp.bfloat16)
            acc = acc + jnp.dot(oh, hi, preferred_element_type=jnp.float32)
            acc = acc + jnp.dot(oh, lo, preferred_element_type=jnp.float32)
        else:
            acc = acc + jnp.dot(onehot.astype(table_ref.dtype), chunk,
                                preferred_element_type=jnp.float32)

    # Scale applied once on the full (T, D) tile, dense store.
    out_ref[...] = (acc * scale).astype(out_ref.dtype)


# --------------------------------------------------------------------------
# Path 2: table stays in HBM, per-row DMA gather with deep in-flight window.
# --------------------------------------------------------------------------
def _embed_hbm_kernel(ids_ref, table_hbm, out_ref, gather_buf, sems,
                      *, scale, tokens_per_tile, max_inflight):
    """ids_ref: all ids in SMEM; table_hbm: (V, D) HBM; out_ref/gather_buf: (T, D)."""
    base = pl.program_id(0) * tokens_per_tile
    nf = max_inflight                                    # python int, <= tokens_per_tile

    def issue(t, row):
        pltpu.make_async_copy(
            table_hbm.at[pl.ds(row, 1), :],
            gather_buf.at[pl.ds(t, 1), :],
            sems.at[t % nf],
        ).start()

    # Prime the in-flight window.
    @pl.loop(0, nf)
    def _prologue(t):
        issue(t, ids_ref[base + t])

    # Steady state: retire the oldest copy on a slot, immediately refill it.
    @pl.loop(0, tokens_per_tile)
    def _steady(t):
        t_next = t + nf
        # Read the next id from SMEM *before* the wait (avoids sst->sld stall).
        row_next = ids_ref[base + jnp.minimum(t_next, tokens_per_tile - 1)]
        slot = t % nf
        # All copies on a slot move identical (1, D) byte counts, so this
        # same-shaped descriptor retires exactly the outstanding copy for row t.
        pltpu.make_async_copy(
            table_hbm.at[pl.ds(0, 1), :],
            gather_buf.at[pl.ds(t, 1), :],
            sems.at[slot],
        ).wait()

        @pl.when(t_next < tokens_per_tile)
        def _():
            issue(t_next, row_next)

    # TODO(synk): double-buffer gather_buf across tiles to overlap the next
    # tile's row DMAs with this tile's scale+store.
    out_ref[...] = (gather_buf[...].astype(jnp.float32) * scale).astype(out_ref.dtype)


# --------------------------------------------------------------------------
# Wrapper.
# --------------------------------------------------------------------------
def embeddings_forward(token_ids, table, d_model=None, *,
                       tile_tokens=512,
                       vocab_chunk=1024,
                       max_inflight_dmas=16,
                       vmem_budget_bytes=None,
                       force_hbm_gather=False):
    """token_ids: int array of any shape; table: (vocab, d_model).

    Returns token_ids.shape + (d_model,) array: table[ids] * sqrt(d_model).
    """
    vocab, D = table.shape
    if d_model is None:
        d_model = D
    assert D == d_model, "embedding table width must equal d_model"

    orig_shape = token_ids.shape
    n = int(math.prod(orig_shape)) if len(orig_shape) > 0 else 1

    scale = float(math.sqrt(d_model))
    itemsize = jnp.dtype(table.dtype).itemsize
    table_bytes = vocab * D * itemsize

    # Clamp ids (gathers have no runtime bounds check), flatten, int32.
    ids_flat = jnp.clip(token_ids.reshape((n,)).astype(jnp.int32), 0, vocab - 1)

    # Token tile: multiple of 8 sublanes, <= tile_tokens, shrunk for tiny inputs.
    T = min(_round_up(max(tile_tokens, 8), 8), _round_up(max(n, 8), 8))
    n_pad = _round_up(n, T)
    if n_pad != n:
        ids_flat = jnp.pad(ids_flat, (0, n_pad - n))     # pad with row 0 (valid)
    grid = (n_pad // T,)

    out_tile_bytes = T * D * itemsize

    # Generation-aware VMEM budget (per TensorCore: 128 MiB on v5e/v6e, 64 MiB on v7x).
    try:
        vmem_cap = int(pltpu.get_tpu_info().vmem_capacity_bytes)
    except Exception:
        vmem_cap = 64 << 20
    if vmem_budget_bytes is None:
        vmem_budget_bytes = int(0.78 * vmem_cap)

    vchunk = max(8, min(int(vocab_chunk), vocab))
    # One-hot path working set: one-hot chunk + bf16 hi/lo chunk + f32 accumulator.
    onehot_work = T * vchunk * 4 + 2 * vchunk * D * 2 + 2 * T * D * 4
    # Grid-invariant table is still double-buffered by default -> budget 2x.
    # TODO(synk): pipeline_mode=pl.Buffered(1) on the table spec would halve this.
    resident_need = 2 * table_bytes + 2 * out_tile_bytes + 2 * (T * 4) + onehot_work

    use_vmem_table = (not force_hbm_gather) and \
        (resident_need + (4 << 20) <= vmem_budget_bytes)

    if use_vmem_table:
        kernel = functools.partial(
            _embed_onehot_kernel, scale=scale, vocab=vocab, vchunk=vchunk)
        ids_in = ids_flat.reshape(n_pad, 1)              # per-tile blocked VMEM ids
        in_specs = [
            pl.BlockSpec((T, 1), lambda i: (i, 0)),      # ids tile
            pl.BlockSpec((vocab, D), lambda i: (0, 0)),  # resident table (fetched once)
        ]
        scratch_shapes = []
        vmem_need = resident_need
    else:
        nf = max(1, min(int(max_inflight_dmas), T))
        kernel = functools.partial(
            _embed_hbm_kernel, scale=scale, tokens_per_tile=T, max_inflight=nf)
        ids_in = ids_flat
        # TODO(synk): for very large token counts, block the ids into SMEM per
        # tile instead of staging the whole flattened id array in SMEM.
        in_specs = [
            pl.BlockSpec(memory_space=pltpu.MemorySpace.SMEM),  # ids (scalar reads)
            pl.BlockSpec(memory_space=pl.ANY),                  # table stays in HBM
        ]
        scratch_shapes = [pltpu.VMEM((T, D), table.dtype),
                          pltpu.SemaphoreType.DMA((nf,))]
        vmem_need = 3 * out_tile_bytes

    vmem_limit = min(max(int(vmem_need) + (8 << 20), 32 << 20), vmem_cap)

    out = pl.pallas_call(
        kernel,
        out_shape=jax.ShapeDtypeStruct((n_pad, D), table.dtype),
        grid_spec=pltpu.PrefetchScalarGridSpec(
            num_scalar_prefetch=0,
            grid=grid,
            in_specs=in_specs,
            out_specs=pl.BlockSpec((T, D), lambda i: (i, 0)),
            scratch_shapes=scratch_shapes,
        ),
        compiler_params=pltpu.CompilerParams(
            dimension_semantics=("parallel",),            # independent token tiles
            vmem_limit_bytes=vmem_limit,
        ),
    )(ids_in, table)

    if n_pad != n:
        out = out[:n]
    return out.reshape(*orig_shape, D)


if __name__ == "__main__":
    key = jax.random.PRNGKey(0)
    k_tab, k_ids = jax.random.split(key)

    d_model, vocab = 128, 64
    B, S = 2, 8

    # nn.Embedding default init is N(0, 1) on the weight.
    table = jax.random.normal(k_tab, (vocab, d_model), dtype=jnp.float32)
    token_ids = jax.random.randint(k_ids, (B, S), 0, vocab, dtype=jnp.int32)

    # Pure-JAX reference.
    ref = (jnp.take(table, token_ids.reshape(-1), axis=0)
           .reshape(B, S, d_model) * math.sqrt(d_model))

    # Path 1: VMEM-resident table, one-hot MXU gather (default for small tables).
    out = jax.block_until_ready(embeddings_forward(token_ids, table, d_model))
    assert out.shape == (B, S, d_model)
    assert out.dtype == jnp.float32
    assert jnp.allclose(out, ref, atol=1e-3, rtol=1e-3), \
        float(jnp.max(jnp.abs(out - ref)))

    # Path 2: manual HBM row-gather (large-table path), exercised on same inputs.
    out2 = jax.block_until_ready(
        embeddings_forward(token_ids, table, d_model, force_hbm_gather=True))
    assert jnp.allclose(out2, ref, atol=1e-5, rtol=1e-5)

    print("KERNEL_OK")
</pallas_src>

<mosaic_0001>
module attributes {stable_mosaic.version = 11 : i64} {
  func.func @_embed_onehot_kernel(%arg0: i32, %arg1: memref<16x1xi32, #tpu.memory_space<vmem>>, %arg2: memref<64x128xf32, #tpu.memory_space<vmem>>, %arg3: memref<16x128xf32, #tpu.memory_space<vmem>>) attributes {dimension_semantics = [#tpu.dimension_semantics<parallel>], iteration_bounds = array<i64: 1>, scalar_prefetch = 0 : i64, scratch_operands = 0 : i64, tpu.core_type = #tpu.core_type<tc>, window_params = [{transform_indices = @transform_0, window_bounds = array<i64: 16, 1>}, {pipeline_mode = #tpu.pipeline_mode<synchronous>, transform_indices = @transform_1, window_bounds = array<i64: 64, 128>}, {transform_indices = @transform_2, window_bounds = array<i64: 16, 128>}]} {
    %c0 = arith.constant 0 : index
    %c0_0 = arith.constant 0 : index
    %0 = vector.load %arg1[%c0, %c0_0] : memref<16x1xi32, #tpu.memory_space<vmem>>, vector<16x1xi32>
    %cst = arith.constant 0.000000e+00 : f32
    %1 = vector.broadcast %cst : f32 to vector<16x128xf32>
    %2 = tpu.iota {dimensions = array<i32: 1>} : vector<16x64xi32>
    %c0_i32 = arith.constant 0 : i32
    %3 = vector.broadcast %c0_i32 : i32 to vector<16x64xi32>
    %4 = arith.addi %2, %3 : vector<16x64xi32>
    %5 = vector.broadcast %0 : vector<16x1xi32> to vector<16x64xi32>
    %6 = arith.cmpi eq, %5, %4 : vector<16x64xi32>
    %cst_1 = arith.constant 1.000000e+00 : f32
    %cst_2 = arith.constant 0.000000e+00 : f32
    %7 = vector.broadcast %cst_1 : f32 to vector<16x64xf32>
    %8 = vector.broadcast %cst_2 : f32 to vector<16x64xf32>
    %9 = arith.select %6, %7, %8 : vector<16x64xi1>, vector<16x64xf32>
    %c0_3 = arith.constant 0 : index
    %c0_4 = arith.constant 0 : index
    %10 = vector.load %arg2[%c0_3, %c0_4] : memref<64x128xf32, #tpu.memory_space<vmem>>, vector<64x128xf32>
    %11 = arith.truncf %10 : vector<64x128xf32> to vector<64x128xbf16>
    %12 = arith.extf %11 : vector<64x128xbf16> to vector<64x128xf32>
    %13 = arith.subf %10, %12 : vector<64x128xf32>
    %14 = arith.truncf %13 : vector<64x128xf32> to vector<64x128xbf16>
    %15 = arith.truncf %9 : vector<16x64xf32> to vector<16x64xbf16>
    %cst_5 = arith.constant dense<0.000000e+00> : vector<16x128xf32>
    %16 = tpu.matmul %15, %11, %cst_5 {dimension_numbers = #tpu.dot_dimension_numbers<[1], [0], [0], [1], [0, 0, 1, 1], [], []>} : vector<16x64xbf16>, vector<64x128xbf16>, vector<16x128xf32> -> vector<16x128xf32>
    %17 = arith.addf %1, %16 : vector<16x128xf32>
    %cst_6 = arith.constant dense<0.000000e+00> : vector<16x128xf32>
    %18 = tpu.matmul %15, %14, %cst_6 {dimension_numbers = #tpu.dot_dimension_numbers<[1], [0], [0], [1], [0, 0, 1, 1], [], []>} : vector<16x64xbf16>, vector<64x128xbf16>, vector<16x128xf32> -> vector<16x128xf32>
    %19 = arith.addf %17, %18 : vector<16x128xf32>
    %cst_7 = arith.constant 11.3137083 : f32
    %20 = vector.broadcast %cst_7 : f32 to vector<16x128xf32>
    %21 = arith.mulf %19, %20 : vector<16x128xf32>
    %c0_8 = arith.constant 0 : index
    %c0_9 = arith.constant 0 : index
    %22 = vector.load %arg3[%c0_8, %c0_9] : memref<16x128xf32, #tpu.memory_space<vmem>>, vector<16x128xf32>
    tpu.vector_store %arg3[%c0_8, %c0_9], %21 {strides = array<i32>} : memref<16x128xf32, #tpu.memory_space<vmem>>, vector<16x128xf32>,
    return
  }
  func.func @transform_0(%arg0: i32) -> (i32, i32) {
    %c0_i32 = arith.constant 0 : i32
    %c0_i32_0 = arith.constant 0 : i32
    return %arg0, %c0_i32 : i32, i32
  }
  func.func @transform_1(%arg0: i32) -> (i32, i32) {
    %c0_i32 = arith.constant 0 : i32
    %c0_i32_0 = arith.constant 0 : i32
    %c0_i32_1 = arith.constant 0 : i32
    return %c0_i32, %c0_i32_0 : i32, i32
  }
  func.func @transform_2(%arg0: i32) -> (i32, i32) {
    %c0_i32 = arith.constant 0 : i32
    %c0_i32_0 = arith.constant 0 : i32
    return %arg0, %c0_i32 : i32, i32
  }
}

</mosaic_0001>

<bundles_post_ra>
// kernel: tpu_custom_call.1
= control target key start
LH: loop header
LB: loop body
LE: loop exit
PB: predicated region body
PF: predicated region fallthrough
CT: control target
= control target key end

     0   :  { %7 = vsyncpa [#allocation3], 0  ;;  %s345_s0 = inlined_call_operand.vmem [shape: s32[16,1], index: 0, kind: input, shape index: {}]   ;;  %s346_s1 = inlined_call_operand.hbm [shape: f32[64,128], index: 1, kind: input, shape index: {}]   ;;  %s347_s2 = inlined_call_operand.hbm [shape: f32[16,128], index: 2, kind: output, shape index: {}]  }
   0x1   :  { %8 = vsyncpa [#allocation4], 0  ;;  %s275_s9 = smov [#allocation2]   ;;  %s227_s13 = scalar_lea.hbm %s346_s1, 1024 }
   0x2   :  { %s16_s10 = sshll.u32 %s275_s9, 4  ;;  %p228_p0 = scmp.ne.s32.totalorder %s346_s1, %s227_s13  ;;  %s17_s10 = int_to_ptr.vmem [resolvable:$true] %s16_s10 }
   0x3   :  { %p231_p1 = scmp.lt.u32.totalorder %s227_s13, %s346_s1 }
   0x5   :  { %p233_p2 = pnand %p231_p1, %p228_p0 }
   0x7   :  { %236 = shalt.err (!%p233_p2)
}
   0x8   :  { %s237_s18 = scalar_lea.vmem %s17_s10, 1024  ;;  %p242_p4 = scmp.lt.s32.totalorder %s17_s10, %s17_s10 }
   0x9   :  { %p238_p3 = scmp.ne.s32.totalorder %s17_s10, %s237_s18  ;;  %p243_p5 = scmp.lt.s32.totalorder %s237_s18, %s237_s18 }
   0xb   :  { %p244_p6 = por %p243_p5, %p242_p4 }
   0xd   :  { %p245_p7 = pnand %p244_p6, %p238_p3 }
   0xf   :  { %248 = shalt.err (!%p245_p7)
}
  0x10   :  { %s276_s19 = smov 128   ;;  %s277_s20 = smov 8  }
  0x11   :  { %22 = dma.hbm_to_vmem [thread:$0]  %s346_s1, 1024, %s17_s10, [#allocation3], %s276_s19, %s276_s19, %s277_s20  }
  0x12   :  { %271 = dma.done.wait [#allocation3], 1024  }
  0x13   :  { %272 = vsyncadd [#allocation3], 4294966272  ;;  %v278_v0 = vmov 0   ;;  %v279_v1 = vmov 0.0   ;;  %v27_v2 = vld [vmem:[%s345_s0] sm:$0xff]  ;;  %v28_v3 = vld [vmem:[%s345_s0 + $0x8] sm:$0xff]  ;;  %v29_v36 = vlaneseq }
  0x14   :  { %226 = vset.pattern.permute.xlu0 %v278_v0  ;;  %193 = vmatprep.subr.bf16.mxu1 %v279_v1  ;;  %v41_v4 = vld [vmem:[#allocation2] sm:$0xff]  ;;  %v42_v5 = vld [vmem:[#allocation2 + $0x8] sm:$0xff]  ;;  %v43_v6 = vld [vmem:[#allocation2 + $0x10] sm:$0xff]  ;;  %vm280_vm0 = vmmov 0   ;;  %vm74_vm3 = vcmask 523264   ;;  %s281_s0 = smov [#allocation5]  }
  0x15   :  { %205 = vmatprep.subr.bf16.mxu0 %v279_v1  ;;  %32 = vperm.xlu0 %226, %v27_v2   ;;  %v44_v7 = vld [vmem:[#allocation2 + $0x18] sm:$0xff]  ;;  %v49_v8 = vpack.c.bf16 %v42_v5, %v41_v4  ;;  %v45_v10 = vld [vmem:[#allocation2 + $0x20] sm:$0xff]  ;;  %v46_v11 = vld [vmem:[#allocation2 + $0x28] sm:$0xff]  ;;  %v30_v37 = vand.u32 127, %v29_v36  ;;  %s169_s1 = sshll.u32 %s281_s0, 4  ;;  %s170_s1 = int_to_ptr.vmem [resolvable:$true] %s169_s1 }
  0x16   :  { %v50_v9 = vpack.c.bf16 %v44_v7, %v43_v6  ;;  %v47_v12 = vld [vmem:[#allocation2 + $0x30] sm:$0xff]  ;;  %v51_v13 = vpack.c.bf16 %v46_v11, %v45_v10  ;;  %v48_v14 = vld [vmem:[#allocation2 + $0x38] sm:$0xff]  ;;  %201 = vmatprep.mubr.msk.bf16.mxu1 %vm280_vm0, %v279_v1  ;;  %213 = vmatprep.mubr.msk.bf16.mxu0 %vm280_vm0, %v279_v1  ;;  %s249_s27 = scalar_lea.vmem %s170_s1, 256  ;;  %p254_p9 = scmp.lt.s32.totalorder %s170_s1, %s170_s1 }
  0x17   :  { %v53_v15 = vunpack.c.l.bf16 %v49_v8  ;;  %v54_v16 = vunpack.c.h.bf16 %v49_v8  ;;  %206 = vmatpush3.bf16.msra.mxu0 %v49_v8  ;;  %v52_v21 = vpack.c.bf16 %v48_v14, %v47_v12  ;;  %p250_p8 = scmp.ne.s32.totalorder %s170_s1, %s249_s27  ;;  %p255_p10 = scmp.lt.s32.totalorder %s249_s27, %s249_s27 }
  0x18   :  { %v55_v17 = vunpack.c.l.bf16 %v50_v9  ;;  %v56_v18 = vunpack.c.h.bf16 %v50_v9  ;;  %207 = vmatprep.subr.bf16.mxu0 %v279_v1  ;;  %v57_v19 = vunpack.c.l.bf16 %v51_v13  ;;  %v58_v20 = vunpack.c.h.bf16 %v51_v13 }
  0x19   :  { %35 = vperm.xlu0 %226, %v28_v3   ;;  %v61_v22 = vsub.f32 %v41_v4, %v53_v15  ;;  %v62_v23 = vsub.f32 %v42_v5, %v54_v16  ;;  %v59_v30 = vunpack.c.l.bf16 %v52_v21  ;;  %v60_v31 = vunpack.c.h.bf16 %v52_v21  ;;  %p256_p11 = por %p255_p10, %p254_p9 }
  0x1a   :  { %v63_v24 = vsub.f32 %v43_v6, %v55_v17  ;;  %v64_v25 = vsub.f32 %v44_v7, %v56_v18  ;;  %v65_v27 = vsub.f32 %v45_v10, %v57_v19  ;;  %v66_v29 = vsub.f32 %v46_v11, %v58_v20 }
  0x1b   :  { %v69_v26 = vpack.c.bf16 %v62_v23, %v61_v22  ;;  %208 = vmatpush3.bf16.msra.mxu0 %v50_v9  ;;  %v67_v33 = vsub.f32 %v47_v12, %v59_v30  ;;  %v68_v34 = vsub.f32 %v48_v14, %v60_v31  ;;  %p257_p12 = pnand %p256_p11, %p250_p8 }
  0x1c   :  { %209 = vmatprep.subr.bf16.mxu0 %v279_v1  ;;  %v70_v28 = vpack.c.bf16 %v64_v25, %v63_v24  ;;  %v71_v32 = vpack.c.bf16 %v66_v29, %v65_v27 }
  0x1d   :  { %194 = vmatpush3.bf16.msra.mxu1 %v69_v26  ;;  %v72_v35 = vpack.c.bf16 %v68_v34, %v67_v33 }
  0x1e   :  { %195 = vmatprep.subr.bf16.mxu1 %v279_v1 }
  0x1f   :  { %210 = vmatpush3.bf16.msra.mxu0 %v51_v13 }
  0x20   :  { %211 = vmatprep.subr.bf16.mxu0 %v279_v1 }
  0x21   :  { %196 = vmatpush3.bf16.msra.mxu1 %v70_v28 }
  0x22   :  { %197 = vmatprep.subr.bf16.mxu1 %v279_v1 }
  0x23   :  { %212 = vmatpush3.bf16.msra.mxu0 %v52_v21 }
  0x25   :  { %198 = vmatpush3.bf16.msra.mxu1 %v71_v32 }
  0x26   :  { %199 = vmatprep.subr.bf16.mxu1 %v279_v1 }
  0x29   :  { %200 = vmatpush3.bf16.msra.mxu1 %v72_v35 }
  0x94   :  { %v33_v38 = vpop.permute.xlu0 %32 }
  0x95   :  { %vm37_vm1 = vcmp.eq.s32.totalorder %v33_v38, %v30_v37 }
  0x96   :  { %v39_v40 = vsel %vm37_vm1, 1.0, %v279_v1 }
  0x98   :  { %v36_v39 = vpop.permute.xlu0 %35 }
  0x99   :  { %vm38_vm2 = vcmp.eq.s32.totalorder %v36_v39, %v30_v37 }
  0x9a   :  { %v40_v41 = vsel %vm38_vm2, 1.0, %v279_v1 }
  0x9b   :  { %v73_v42 = vpack.c.bf16 %v40_v41, %v39_v40 }
  0x9d   :  { %202 = vmatmul.mubr.msk.bf16.vlgmr.msra.gmra.mrb[0].mxu1 %vm74_vm3, %v73_v42  ;;  %214 = vmatmul.mubr.msk.bf16.vlgmr.msra.gmra.mrb[0].mxu0 %vm74_vm3, %v73_v42 }
 0x170   :  { %v112_v43 = vpop.f32.mrb[0].mxu1  ;;  %v153_v44 = vpop.f32.mrb[0].mxu0 }
 0x171   :  { %v154_v45 = vadd.f32 %v153_v44, %v112_v43  ;;  %v203_v46 = vpop.f32.mrb[1].mxu1  ;;  %v215_v47 = vpop.f32.mrb[1].mxu0 }
 0x172   :  { %v115_v48 = vpop.f32.mrb[2].mxu1  ;;  %v156_v49 = vpop.f32.mrb[2].mxu0 }
 0x173   :  { %v160_v50 = vmul.f32 11.313708, %v154_v45  ;;  %v157_v51 = vadd.f32 %v156_v49, %v115_v48  ;;  %v204_v52 = vpop.f32.mrb[3].mxu1  ;;  %v216_v53 = vpop.f32.mrb[3].mxu0 }
 0x175   :  { %162 = vst [vmem:[#allocation5] sm:$0xff] %v160_v50  ;;  %v161_v54 = vmul.f32 11.313708, %v157_v51 }
 0x177   :  { %163 = vst [vmem:[#allocation5 + $0x8] sm:$0xff] %v161_v54 }
 0x178   :  { %260 = shalt.err (!%p257_p12)
}
 0x179   :  { %s261_s30 = scalar_lea.hbm %s347_s2, 256 }
 0x17a   :  { %p262_p13 = scmp.ne.s32.totalorder %s347_s2, %s261_s30  ;;  %p265_p0 = scmp.lt.u32.totalorder %s261_s30, %s347_s2 }
 0x17c   :  { %p267_p1 = pnand %p265_p0, %p262_p13 }
 0x17e   :  { %270 = shalt.err (!%p267_p1)
}
 0x17f   :  { %175 = dma.vmem_to_hbm [thread:$0]  %s170_s1, 256, %s347_s2, [#allocation4], %s276_s19, %s276_s19, %s277_s20  }
 0x180   :  { %273 = dma.done.wait [#allocation4], 256  }
 0x181   :  { %274 = vsyncadd [#allocation4], 4294967040 }
 0x182   :  { %179 = vsyncpa [#allocation3], 1 }
 0x183   :  { %180 = vsyncpa [#allocation4], 1 }

</bundles_post_ra>
